<compile_context>
chip_gen: v7x
topology: tpu7x:2x2x1
jax: 0.10.0
libtpu: 0.0.40
codegen_flags: <defaults>
</compile_context>

<pallas_src>
import functools

import jax
import jax.numpy as jnp
from jax.experimental import pallas as pl
from jax.experimental.pallas import tpu as pltpu

LANE = 128      # lane width (last dim of every tile)
TM_MAX = 1024   # max rows per grid step (1024x128 f32 tile = 512 KiB)


def _mse_usr_kernel(params_ref, pred_ref, wt_ref, out_ref,
                    acc_sq, acc_cnt, acc_ls, *, n_elems, rows):
    i = pl.program_id(0)
    last = pl.num_programs(0) - 1

    @pl.when(i == 0)
    def _init():
        acc_sq[...] = jnp.zeros_like(acc_sq)
        acc_cnt[...] = jnp.zeros_like(acc_cnt)
        acc_ls[...] = jnp.zeros_like(acc_ls)

    duration = params_ref[0]
    eps = params_ref[1]
    inv_2eps2 = 1.0 / (2.0 * eps * eps)
    scale = 1.6 / eps

    pred = pred_ref[...].astype(jnp.float32)
    wt = wt_ref[...].astype(jnp.float32)
    tm, tl = pred.shape

    diff = pred - wt
    sq = diff * diff * inv_2eps2
    x = scale * diff
    # numerically stable -logsigmoid: -(min(x,0) - log1p(exp(-|x|)))
    neg_logsig = jnp.log1p(jnp.exp(-jnp.abs(x))) - jnp.minimum(x, 0.0)

    # NaN-padded lane tail fails both comparisons -> contributes to neither.
    less = wt < duration
    over = wt >= duration

    def accumulate(less_m, over_m):
        acc_sq[...] += jnp.where(less_m, sq, 0.0)
        acc_cnt[...] += jnp.where(less_m, 1.0, 0.0)
        acc_ls[...] += jnp.where(over_m, neg_logsig, 0.0)

    @pl.when(i < last)
    def _bulk():
        # all bulk blocks are fully in-bounds: no validity mask needed
        accumulate(less, over)

    @pl.when(i == last)
    def _tail_and_finalize():
        # mask rows of the (possibly partial) last block that lie past `rows`
        row = jax.lax.broadcasted_iota(jnp.int32, (tm, tl), 0)
        rvalid = (i * tm + row) < rows
        accumulate(jnp.logical_and(less, rvalid),
                   jnp.logical_and(over, rvalid))

        # single set of cross-lane reductions, done once
        sum_sq = jnp.sum(acc_sq[...])
        cnt_less = jnp.sum(acc_cnt[...])
        sum_ls = jnp.sum(acc_ls[...])
        cnt_over = jnp.float32(n_elems) - cnt_less
        out_ref[0] = sum_sq / cnt_less + sum_ls / cnt_over


def mse_usr(wt_pred, wt, duration, eps):
    """Pallas implementation of MSE_usr.forward. Returns a scalar f32."""
    n = wt_pred.size
    pred_flat = jnp.ravel(wt_pred)   # keep source dtype (bf16 stays bf16)
    wt_flat = jnp.ravel(wt)

    # Pad only to a LANE multiple (needed for the 2-D reshape); wt is padded
    # with NaN so padded elements fall into neither branch -> no in-kernel
    # element-validity mask for this tail.
    lane_pad = (-n) % LANE
    if lane_pad:
        pred_flat = jnp.pad(pred_flat, (0, lane_pad))
        wt_flat = jnp.pad(wt_flat, (0, lane_pad), constant_values=jnp.nan)

    rows = (n + lane_pad) // LANE
    pred2 = pred_flat.reshape(rows, LANE)
    wt2 = wt_flat.reshape(rows, LANE)

    tm = min(TM_MAX, rows)               # block rows; <= rows so spec is legal
    grid = (pl.cdiv(rows, tm),)

    params = jnp.stack([jnp.asarray(duration, jnp.float32),
                        jnp.asarray(eps, jnp.float32)])

    kernel = functools.partial(_mse_usr_kernel, n_elems=float(n), rows=rows)

    out = pl.pallas_call(
        kernel,
        out_shape=jax.ShapeDtypeStruct((1,), jnp.float32),
        grid_spec=pltpu.PrefetchScalarGridSpec(
            num_scalar_prefetch=0,
            grid=grid,
            in_specs=[
                pl.BlockSpec(memory_space=pltpu.MemorySpace.SMEM),  # [duration, eps]
                pl.BlockSpec((tm, LANE), lambda i: (i, 0)),          # wt_pred tile
                pl.BlockSpec((tm, LANE), lambda i: (i, 0)),          # wt tile
            ],
            out_specs=pl.BlockSpec(memory_space=pltpu.MemorySpace.SMEM),
            scratch_shapes=[
                pltpu.VMEM((tm, LANE), jnp.float32),   # sum of sq-err (less)
                pltpu.VMEM((tm, LANE), jnp.float32),   # count (less)
                pltpu.VMEM((tm, LANE), jnp.float32),   # sum of -logsigmoid (over)
            ],
        ),
        compiler_params=pltpu.CompilerParams(
            dimension_semantics=("arbitrary",)),  # sequential accumulation
    )(params, pred2, wt2)
    return out[0]


def mse_usr_ref(wt_pred, wt, duration, eps):
    """Pure-JAX reference matching the PyTorch semantics."""
    wt_pred = wt_pred.astype(jnp.float32)
    wt = wt.astype(jnp.float32)
    less = wt < duration
    over = jnp.logical_not(less)
    diff = wt_pred - wt
    n_less = jnp.sum(less.astype(jnp.float32))
    n_over = jnp.sum(over.astype(jnp.float32))
    loss_less = jnp.sum(jnp.where(less, diff * diff / (2.0 * eps * eps), 0.0)) / n_less
    loss_over = jnp.sum(jnp.where(over, -jax.nn.log_sigmoid(1.6 * diff / eps), 0.0)) / n_over
    return loss_less + loss_over


if __name__ == "__main__":
    key = jax.random.PRNGKey(0)
    k1, k2 = jax.random.split(key)

    # small shapes consistent with an elementwise loss over (N, C, H, W) tensors
    shape = (2, 4, 16, 16)
    wt = jax.random.normal(k1, shape, dtype=jnp.float32)
    wt_pred = wt + 0.3 * jax.random.normal(k2, shape, dtype=jnp.float32)
    duration = 0.0   # threshold -> both mask branches are nonempty
    eps = 0.5

    loss = mse_usr(wt_pred, wt, duration, eps)
    jax.block_until_ready(loss)

    loss_ref = mse_usr_ref(wt_pred, wt, duration, eps)
    assert jnp.allclose(loss, loss_ref, rtol=1e-5, atol=1e-5), (loss, loss_ref)

    print("KERNEL_OK")
</pallas_src>

<mosaic_0001>
module attributes {stable_mosaic.version = 11 : i64} {
  func.func @_mse_usr_kernel(%arg0: i32, %arg1: memref<2xf32, #tpu.memory_space<smem>>, %arg2: memref<16x128xf32, #tpu.memory_space<vmem>>, %arg3: memref<16x128xf32, #tpu.memory_space<vmem>>, %arg4: memref<1xf32, #tpu.memory_space<smem>>, %arg5: memref<16x128xf32, #tpu.memory_space<vmem>>, %arg6: memref<16x128xf32, #tpu.memory_space<vmem>>, %arg7: memref<16x128xf32, #tpu.memory_space<vmem>>) attributes {dimension_semantics = [#tpu.dimension_semantics<arbitrary>], iteration_bounds = array<i64: 1>, scalar_prefetch = 0 : i64, scratch_operands = 3 : i64, tpu.core_type = #tpu.core_type<tc>, window_params = [{transform_indices = @transform_0, window_bounds = array<i64: 2>}, {transform_indices = @transform_1, window_bounds = array<i64: 16, 128>}, {transform_indices = @transform_2, window_bounds = array<i64: 16, 128>}, {transform_indices = @transform_3, window_bounds = array<i64: 1>}]} {
    %c0_i32 = arith.constant 0 : i32
    %0 = arith.cmpi eq, %arg0, %c0_i32 : i32
    %1 = arith.extui %0 : i1 to i32
    %c0_i32_0 = arith.constant 0 : i32
    %2 = arith.cmpi ne, %1, %c0_i32_0 : i32
    scf.if %2 {
      %cst_13 = arith.constant 0.000000e+00 : f32
      %35 = vector.broadcast %cst_13 : f32 to vector<16x128xf32>
      %c0_14 = arith.constant 0 : index
      %c0_15 = arith.constant 0 : index
      %36 = vector.load %arg5[%c0_14, %c0_15] : memref<16x128xf32, #tpu.memory_space<vmem>>, vector<16x128xf32>
      tpu.vector_store %arg5[%c0_14, %c0_15], %35 {strides = array<i32>} : memref<16x128xf32, #tpu.memory_space<vmem>>, vector<16x128xf32>,
      %cst_16 = arith.constant 0.000000e+00 : f32
      %37 = vector.broadcast %cst_16 : f32 to vector<16x128xf32>
      %c0_17 = arith.constant 0 : index
      %c0_18 = arith.constant 0 : index
      %38 = vector.load %arg6[%c0_17, %c0_18] : memref<16x128xf32, #tpu.memory_space<vmem>>, vector<16x128xf32>
      tpu.vector_store %arg6[%c0_17, %c0_18], %37 {strides = array<i32>} : memref<16x128xf32, #tpu.memory_space<vmem>>, vector<16x128xf32>,
      %cst_19 = arith.constant 0.000000e+00 : f32
      %39 = vector.broadcast %cst_19 : f32 to vector<16x128xf32>
      %c0_20 = arith.constant 0 : index
      %c0_21 = arith.constant 0 : index
      %40 = vector.load %arg7[%c0_20, %c0_21] : memref<16x128xf32, #tpu.memory_space<vmem>>, vector<16x128xf32>
      tpu.vector_store %arg7[%c0_20, %c0_21], %39 {strides = array<i32>} : memref<16x128xf32, #tpu.memory_space<vmem>>, vector<16x128xf32>,
    } else {
    }
    %c0 = arith.constant 0 : index
    %3 = memref.load %arg1[%c0] : memref<2xf32, #tpu.memory_space<smem>>
    %c1 = arith.constant 1 : index
    %4 = memref.load %arg1[%c1] : memref<2xf32, #tpu.memory_space<smem>>
    %cst = arith.constant 2.000000e+00 : f32
    %5 = arith.mulf %cst, %4 : f32
    %6 = arith.mulf %5, %4 : f32
    %cst_1 = arith.constant 1.000000e+00 : f32
    %7 = arith.divf %cst_1, %6 : f32
    %cst_2 = arith.constant 1.600000e+00 : f32
    %8 = arith.divf %cst_2, %4 : f32
    %c0_3 = arith.constant 0 : index
    %c0_4 = arith.constant 0 : index
    %9 = vector.load %arg2[%c0_3, %c0_4] : memref<16x128xf32, #tpu.memory_space<vmem>>, vector<16x128xf32>
    %c0_5 = arith.constant 0 : index
    %c0_6 = arith.constant 0 : index
    %10 = vector.load %arg3[%c0_5, %c0_6] : memref<16x128xf32, #tpu.memory_space<vmem>>, vector<16x128xf32>
    %11 = arith.subf %9, %10 : vector<16x128xf32>
    %12 = arith.mulf %11, %11 : vector<16x128xf32>
    %13 = vector.broadcast %7 : f32 to vector<16x128xf32>
    %14 = arith.mulf %12, %13 : vector<16x128xf32>
    %15 = vector.broadcast %8 : f32 to vector<16x128xf32>
    %16 = arith.mulf %15, %11 : vector<16x128xf32>
    %17 = math.absf %16 : vector<16x128xf32>
    %cst_7 = arith.constant 0.000000e+00 : f32
    %18 = vector.broadcast %cst_7 : f32 to vector<16x128xf32>
    %19 = arith.subf %18, %17 : vector<16x128xf32>
    %20 = math.exp %19 : vector<16x128xf32>
    %21 = math.log1p %20 : vector<16x128xf32>
    %cst_8 = arith.constant 0.000000e+00 : f32
    %22 = vector.broadcast %cst_8 : f32 to vector<16x128xf32>
    %23 = arith.minimumf %16, %22 : vector<16x128xf32>
    %24 = arith.subf %21, %23 : vector<16x128xf32>
    %25 = vector.broadcast %3 : f32 to vector<16x128xf32>
    %26 = arith.cmpf olt, %10, %25 : vector<16x128xf32>
    %27 = vector.broadcast %3 : f32 to vector<16x128xf32>
    %28 = arith.cmpf oge, %10, %27 : vector<16x128xf32>
    %c0_i32_9 = arith.constant 0 : i32
    %29 = arith.cmpi slt, %arg0, %c0_i32_9 : i32
    %30 = arith.extui %29 : i1 to i32
    %c0_i32_10 = arith.constant 0 : i32
    %31 = arith.cmpi ne, %30, %c0_i32_10 : i32
    scf.if %31 {
      %c0_13 = arith.constant 0 : index
      %c0_14 = arith.constant 0 : index
      %35 = vector.load %arg5[%c0_13, %c0_14] : memref<16x128xf32, #tpu.memory_space<vmem>>, vector<16x128xf32>
      %cst_15 = arith.constant 0.000000e+00 : f32
      %36 = vector.broadcast %cst_15 : f32 to vector<16x128xf32>
      %37 = arith.select %26, %14, %36 : vector<16x128xi1>, vector<16x128xf32>
      %38 = arith.addf %35, %37 : vector<16x128xf32>
      %c0_16 = arith.constant 0 : index
      %c0_17 = arith.constant 0 : index
      %39 = vector.load %arg5[%c0_16, %c0_17] : memref<16x128xf32, #tpu.memory_space<vmem>>, vector<16x128xf32>
      tpu.vector_store %arg5[%c0_16, %c0_17], %38 {strides = array<i32>} : memref<16x128xf32, #tpu.memory_space<vmem>>, vector<16x128xf32>,
      %c0_18 = arith.constant 0 : index
      %c0_19 = arith.constant 0 : index
      %40 = vector.load %arg6[%c0_18, %c0_19] : memref<16x128xf32, #tpu.memory_space<vmem>>, vector<16x128xf32>
      %cst_20 = arith.constant 1.000000e+00 : f32
      %cst_21 = arith.constant 0.000000e+00 : f32
      %41 = vector.broadcast %cst_20 : f32 to vector<16x128xf32>
      %42 = vector.broadcast %cst_21 : f32 to vector<16x128xf32>
      %43 = arith.select %26, %41, %42 : vector<16x128xi1>, vector<16x128xf32>
      %44 = arith.addf %40, %43 : vector<16x128xf32>
      %c0_22 = arith.constant 0 : index
      %c0_23 = arith.constant 0 : index
      %45 = vector.load %arg6[%c0_22, %c0_23] : memref<16x128xf32, #tpu.memory_space<vmem>>, vector<16x128xf32>
      tpu.vector_store %arg6[%c0_22, %c0_23], %44 {strides = array<i32>} : memref<16x128xf32, #tpu.memory_space<vmem>>, vector<16x128xf32>,
      %c0_24 = arith.constant 0 : index
      %c0_25 = arith.constant 0 : index
      %46 = vector.load %arg7[%c0_24, %c0_25] : memref<16x128xf32, #tpu.memory_space<vmem>>, vector<16x128xf32>
      %cst_26 = arith.constant 0.000000e+00 : f32
      %47 = vector.broadcast %cst_26 : f32 to vector<16x128xf32>
      %48 = arith.select %28, %24, %47 : vector<16x128xi1>, vector<16x128xf32>
      %49 = arith.addf %46, %48 : vector<16x128xf32>
      %c0_27 = arith.constant 0 : index
      %c0_28 = arith.constant 0 : index
      %50 = vector.load %arg7[%c0_27, %c0_28] : memref<16x128xf32, #tpu.memory_space<vmem>>, vector<16x128xf32>
      tpu.vector_store %arg7[%c0_27, %c0_28], %49 {strides = array<i32>} : memref<16x128xf32, #tpu.memory_space<vmem>>, vector<16x128xf32>,
    } else {
    }
    %c0_i32_11 = arith.constant 0 : i32
    %32 = arith.cmpi eq, %arg0, %c0_i32_11 : i32
    %33 = arith.extui %32 : i1 to i32
    %c0_i32_12 = arith.constant 0 : i32
    %34 = arith.cmpi ne, %33, %c0_i32_12 : i32
    scf.if %34 {
      %35 = tpu.iota {dimensions = array<i32: 0>} : vector<16x128xi32>
      %c16_i32 = arith.constant 16 : i32
      %36 = arith.muli %arg0, %c16_i32 : i32
      %37 = vector.broadcast %36 : i32 to vector<16x128xi32>
      %38 = arith.addi %37, %35 : vector<16x128xi32>
      %c16_i32_13 = arith.constant 16 : i32
      %39 = vector.broadcast %c16_i32_13 : i32 to vector<16x128xi32>
      %40 = arith.cmpi slt, %38, %39 : vector<16x128xi32>
      %41 = arith.andi %26, %40 : vector<16x128xi1>
      %42 = arith.andi %28, %40 : vector<16x128xi1>
      %c0_14 = arith.constant 0 : index
      %c0_15 = arith.constant 0 : index
      %43 = vector.load %arg5[%c0_14, %c0_15] : memref<16x128xf32, #tpu.memory_space<vmem>>, vector<16x128xf32>
      %cst_16 = arith.constant 0.000000e+00 : f32
      %44 = vector.broadcast %cst_16 : f32 to vector<16x128xf32>
      %45 = arith.select %41, %14, %44 : vector<16x128xi1>, vector<16x128xf32>
      %46 = arith.addf %43, %45 : vector<16x128xf32>
      %c0_17 = arith.constant 0 : index
      %c0_18 = arith.constant 0 : index
      %47 = vector.load %arg5[%c0_17, %c0_18] : memref<16x128xf32, #tpu.memory_space<vmem>>, vector<16x128xf32>
      tpu.vector_store %arg5[%c0_17, %c0_18], %46 {strides = array<i32>} : memref<16x128xf32, #tpu.memory_space<vmem>>, vector<16x128xf32>,
      %c0_19 = arith.constant 0 : index
      %c0_20 = arith.constant 0 : index
      %48 = vector.load %arg6[%c0_19, %c0_20] : memref<16x128xf32, #tpu.memory_space<vmem>>, vector<16x128xf32>
      %cst_21 = arith.constant 1.000000e+00 : f32
      %cst_22 = arith.constant 0.000000e+00 : f32
      %49 = vector.broadcast %cst_21 : f32 to vector<16x128xf32>
      %50 = vector.broadcast %cst_22 : f32 to vector<16x128xf32>
      %51 = arith.select %41, %49, %50 : vector<16x128xi1>, vector<16x128xf32>
      %52 = arith.addf %48, %51 : vector<16x128xf32>
      %c0_23 = arith.constant 0 : index
      %c0_24 = arith.constant 0 : index
      %53 = vector.load %arg6[%c0_23, %c0_24] : memref<16x128xf32, #tpu.memory_space<vmem>>, vector<16x128xf32>
      tpu.vector_store %arg6[%c0_23, %c0_24], %52 {strides = array<i32>} : memref<16x128xf32, #tpu.memory_space<vmem>>, vector<16x128xf32>,
      %c0_25 = arith.constant 0 : index
      %c0_26 = arith.constant 0 : index
      %54 = vector.load %arg7[%c0_25, %c0_26] : memref<16x128xf32, #tpu.memory_space<vmem>>, vector<16x128xf32>
      %cst_27 = arith.constant 0.000000e+00 : f32
      %55 = vector.broadcast %cst_27 : f32 to vector<16x128xf32>
      %56 = arith.select %42, %24, %55 : vector<16x128xi1>, vector<16x128xf32>
      %57 = arith.addf %54, %56 : vector<16x128xf32>
      %c0_28 = arith.constant 0 : index
      %c0_29 = arith.constant 0 : index
      %58 = vector.load %arg7[%c0_28, %c0_29] : memref<16x128xf32, #tpu.memory_space<vmem>>, vector<16x128xf32>
      tpu.vector_store %arg7[%c0_28, %c0_29], %57 {strides = array<i32>} : memref<16x128xf32, #tpu.memory_space<vmem>>, vector<16x128xf32>,
      %c0_30 = arith.constant 0 : index
      %c0_31 = arith.constant 0 : index
      %59 = vector.load %arg5[%c0_30, %c0_31] : memref<16x128xf32, #tpu.memory_space<vmem>>, vector<16x128xf32>
      %60 = vector.shape_cast %59 : vector<16x128xf32> to vector<1x16x128xf32>
      %cst_32 = arith.constant dense<0.000000e+00> : vector<1xf32>
      %61 = vector.multi_reduction <add>, %60, %cst_32 [1, 2] : vector<1x16x128xf32> to vector<1xf32>
      %62 = vector.shape_cast %61 : vector<1xf32> to vector<1x1x1xf32>
      %63 = vector.extract %62[0, 0, 0] : f32 from vector<1x1x1xf32>
      %c0_33 = arith.constant 0 : index
      %c0_34 = arith.constant 0 : index
      %64 = vector.load %arg6[%c0_33, %c0_34] : memref<16x128xf32, #tpu.memory_space<vmem>>, vector<16x128xf32>
      %65 = vector.shape_cast %64 : vector<16x128xf32> to vector<1x16x128xf32>
      %cst_35 = arith.constant dense<0.000000e+00> : vector<1xf32>
      %66 = vector.multi_reduction <add>, %65, %cst_35 [1, 2] : vector<1x16x128xf32> to vector<1xf32>
      %67 = vector.shape_cast %66 : vector<1xf32> to vector<1x1x1xf32>
      %68 = vector.extract %67[0, 0, 0] : f32 from vector<1x1x1xf32>
      %c0_36 = arith.constant 0 : index
      %c0_37 = arith.constant 0 : index
      %69 = vector.load %arg7[%c0_36, %c0_37] : memref<16x128xf32, #tpu.memory_space<vmem>>, vector<16x128xf32>
      %70 = vector.shape_cast %69 : vector<16x128xf32> to vector<1x16x128xf32>
      %cst_38 = arith.constant dense<0.000000e+00> : vector<1xf32>
      %71 = vector.multi_reduction <add>, %70, %cst_38 [1, 2] : vector<1x16x128xf32> to vector<1xf32>
      %72 = vector.shape_cast %71 : vector<1xf32> to vector<1x1x1xf32>
      %73 = vector.extract %72[0, 0, 0] : f32 from vector<1x1x1xf32>
      %cst_39 = arith.constant 2.048000e+03 : f32
      %74 = arith.subf %cst_39, %68 : f32
      %75 = arith.divf %63, %68 : f32
      %76 = arith.divf %73, %74 : f32
      %77 = arith.addf %75, %76 : f32
      %c0_40 = arith.constant 0 : index
      %78 = memref.load %arg4[%c0_40] : memref<1xf32, #tpu.memory_space<smem>>
      memref.store %77, %arg4[%c0_40] : memref<1xf32, #tpu.memory_space<smem>>
    } else {
    }
    return
  }
  func.func @transform_0(%arg0: i32) -> i32 {
    %c0_i32 = arith.constant 0 : i32
    %c0_i32_0 = arith.constant 0 : i32
    return %c0_i32 : i32
  }
  func.func @transform_1(%arg0: i32) -> (i32, i32) {
    %c0_i32 = arith.constant 0 : i32
    %c0_i32_0 = arith.constant 0 : i32
    return %arg0, %c0_i32 : i32, i32
  }
  func.func @transform_2(%arg0: i32) -> (i32, i32) {
    %c0_i32 = arith.constant 0 : i32
    %c0_i32_0 = arith.constant 0 : i32
    return %arg0, %c0_i32 : i32, i32
  }
  func.func @transform_3(%arg0: i32) -> i32 {
    %c0_i32 = arith.constant 0 : i32
    %c0_i32_0 = arith.constant 0 : i32
    return %c0_i32 : i32
  }
}

</mosaic_0001>

<bundles_post_ra>
// kernel: tpu_custom_call.1
= control target key start
LH: loop header
LB: loop body
LE: loop exit
PB: predicated region body
PF: predicated region fallthrough
CT: control target
= control target key end

     0   :  { %8 = vsyncpa [#allocation7], 0  ;;  %s451_s0 = inlined_call_operand.hbm [shape: f32[2], index: 0, kind: input, shape index: {}]   ;;  %s452_s1 = inlined_call_operand.hbm [shape: f32[16,128], index: 1, kind: input, shape index: {}]   ;;  %s453_s2 = inlined_call_operand.hbm [shape: f32[16,128], index: 2, kind: input, shape index: {}]   ;;  %s454_s3 = inlined_call_operand.hbm [shape: f32[1], index: 3, kind: output, shape index: {}]  }
   0x1   :  { %9 = vsyncpa [#allocation6], 0 }
   0x2   :  { %10 = vsyncpa [#allocation11], 0 }
   0x3   :  { %11 = vsyncpa [#allocation8], 0  ;;  %s294_s14 = scalar_lea.hbm %s451_s0, 16 }
   0x4   :  { %p295_p0 = scmp.ne.s32.totalorder %s451_s0, %s294_s14  ;;  %p298_p1 = scmp.lt.u32.totalorder %s294_s14, %s451_s0 }
   0x6   :  { %p300_p2 = pnand %p298_p1, %p295_p0 }
   0x8   :  { %303 = shalt.err (!%p300_p2)
}
   0x9   :  { %s366_s19 = smov [#allocation5]   ;;  %s367_s22 = smov [#allocation9]  }
   0xa   :  { %19 = dma.hbm_to_smem %s451_s0, 16, %s366_s19, [#allocation7]  }
   0xb   :  { %s25_s23 = sshll.u32 %s367_s22, 4  ;;  %s304_s26 = scalar_lea.hbm %s452_s1, 256  ;;  %s26_s23 = int_to_ptr.vmem [resolvable:$true] %s25_s23 }
   0xc   :  { %p305_p3 = scmp.ne.s32.totalorder %s452_s1, %s304_s26  ;;  %p308_p4 = scmp.lt.u32.totalorder %s304_s26, %s452_s1 }
   0xe   :  { %p310_p5 = pnand %p308_p4, %p305_p3 }
  0x10   :  { %313 = shalt.err (!%p310_p5)
}
  0x11   :  { %s314_s4 = scalar_lea.vmem %s26_s23, 256  ;;  %p319_p7 = scmp.lt.s32.totalorder %s26_s23, %s26_s23 }
  0x12   :  { %p315_p6 = scmp.ne.s32.totalorder %s26_s23, %s314_s4  ;;  %p320_p8 = scmp.lt.s32.totalorder %s314_s4, %s314_s4 }
  0x14   :  { %p321_p9 = por %p320_p8, %p319_p7 }
  0x16   :  { %p322_p10 = pnand %p321_p9, %p315_p6 }
  0x18   :  { %325 = shalt.err (!%p322_p10)
}
  0x19   :  { %s368_s0 = smov 128   ;;  %s369_s5 = smov 8  }
  0x1a   :  { %31 = dma.hbm_to_vmem [thread:$0]  %s452_s1, 256, %s26_s23, [#allocation6], %s368_s0, %s368_s0, %s369_s5  }
  0x1b   :  { %s370_s8 = smov [#allocation10]   ;;  %s326_s12 = scalar_lea.hbm %s453_s2, 256 }
  0x1c   :  { %s37_s9 = sshll.u32 %s370_s8, 4  ;;  %p327_p11 = scmp.ne.s32.totalorder %s453_s2, %s326_s12  ;;  %s38_s9 = int_to_ptr.vmem [resolvable:$true] %s37_s9 }
  0x1d   :  { %p330_p12 = scmp.lt.u32.totalorder %s326_s12, %s453_s2 }
  0x1f   :  { %p332_p13 = pnand %p330_p12, %p327_p11 }
  0x21   :  { %335 = shalt.err (!%p332_p13)
}
  0x22   :  { %s336_s17 = scalar_lea.vmem %s38_s9, 256  ;;  %p341_p1 = scmp.lt.s32.totalorder %s38_s9, %s38_s9 }
  0x23   :  { %p337_p0 = scmp.ne.s32.totalorder %s38_s9, %s336_s17  ;;  %p342_p2 = scmp.lt.s32.totalorder %s336_s17, %s336_s17 }
  0x25   :  { %p343_p3 = por %p342_p2, %p341_p1 }
  0x27   :  { %p344_p4 = pnand %p343_p3, %p337_p0 }
  0x29   :  { %347 = shalt.err (!%p344_p4)
}
  0x2a   :  { %43 = dma.hbm_to_vmem [thread:$0]  %s453_s2, 256, %s38_s9, [#allocation11], %s368_s0, %s368_s0, %s369_s5  }
  0x2b   :  { %358 = dma.done.wait [#allocation7], 16  }
  0x2c   :  { %359 = vsyncadd [#allocation7], 4294967280 }
  0x2d   :  { %360 = dma.done.wait [#allocation6], 256  }
  0x2e   :  { %361 = vsyncadd [#allocation6], 4294967040 }
  0x2f   :  { %362 = dma.done.wait [#allocation11], 256  }
  0x30   :  { %363 = vsyncadd [#allocation11], 4294967040 }
  0x31   :  { %53 = sfence }
  0x32   :  { %s256_s19 = sld [smem:[#allocation5 + $0x1]]  ;;  %v75_v4 = vld [vmem:[#allocation9] sm:$0xff]  ;;  %s64_s2 = sld [smem:[#allocation5]]  ;;  %v76_v5 = vld [vmem:[#allocation9 + $0x8] sm:$0xff]  ;;  %v429_v6 = vld [vmem:[#allocation10] sm:$0xff]  ;;  %v371_v16 = vmov 0.0  }
  0x33   :  { %v431_v7 = vld [vmem:[#allocation10 + $0x8] sm:$0xff]  ;;  %v79_v8 = vsub.f32 %v75_v4, %v429_v6  ;;  %s348_s8 = scalar_lea.hbm %s454_s3, 16 }
  0x34   :  { %v80_v9 = vsub.f32 %v76_v5, %v431_v7  ;;  %p349_p5 = scmp.ne.s32.totalorder %s454_s3, %s348_s8  ;;  %p352_p6 = scmp.lt.u32.totalorder %s348_s8, %s454_s3 }
  0x35   :  { %v81_v10 = vmul.f32 %v79_v8, %v79_v8 }
  0x36   :  { %v82_v11 = vmul.f32 %v80_v9, %v80_v9  ;;  %p354_p7 = pnand %p352_p6, %p349_p5 }
  0x38   :  { %s66_s20 = smul.f32 2.0, %s256_s19  ;;  %v71_v0 = vstv %s256_s19  ;;  %v119_v12 = vstv %s64_s2 }
  0x39   :  { %278 = vrcp.f32 %v71_v0  ;;  %vm120_vm0 = vcmp.lt.f32.partialorder %v429_v6, %v119_v12  ;;  %vm121_vm1 = vcmp.lt.f32.partialorder %v431_v7, %v119_v12  ;;  %vm122_vm4 = vcmp.ge.f32.partialorder %v429_v6, %v119_v12 }
  0x3a   :  { %s67_s21 = smul.f32 %s256_s19, %s66_s20  ;;  %v178_v17 = vsel %vm120_vm0, 1.0, %v371_v16  ;;  %v179_v21 = vsel %vm121_vm1, 1.0, %v371_v16  ;;  %vm123_vm5 = vcmp.ge.f32.partialorder %v431_v7, %v119_v12 }
  0x3b   :  { %v206_v27 = vadd.f32 %v179_v21, %v178_v17 }
  0x3c   :  { %v68_v1 = vstv %s67_s21 }
  0x3d   :  { %280 = vrcp.f32 %v68_v1 }
  0x43   :  { %v279_v2 = vpop.eup %278 }
  0x47   :  { %v281_v3 = vpop.eup %280 }
  0x48   :  { %257 = vpush %v281_v3 }
  0x49   :  { %259 = vpush %v279_v2 }
  0x79   :  { %s258_s22 = spop %257 }
  0x7a   :  { %v83_v13 = vstv %s258_s22  ;;  %s260_s23 = spop %259 }
  0x7b   :  { %v84_v14 = vmul.f32 %v83_v13, %v81_v10  ;;  %v85_v15 = vmul.f32 %v83_v13, %v82_v11  ;;  %s74_s24 = smul.f32 1.6, %s260_s23 }
  0x7d   :  { %v86_v18 = vstv %s74_s24  ;;  %v170_v19 = vsel %vm120_vm0, %v84_v14, 0.0  ;;  %v171_v20 = vsel %vm121_vm1, %v85_v15, 0.0 }
  0x7e   :  { %v87_v22 = vmul.f32 %v86_v18, %v79_v8  ;;  %v88_v23 = vmul.f32 %v86_v18, %v80_v9  ;;  %v194_v24 = vadd.f32 %v171_v20, %v170_v19 }
  0x80   :  { %v89_v25 = vand.u32 2147483647, %v87_v22  ;;  %v90_v26 = vand.u32 2147483647, %v88_v23  ;;  %195 = vadd.xlane.f32.xlu0 %v194_v24  ;;  %v115_v44 = vmin.f32 %v87_v22, 0.0  ;;  %v116_v47 = vmin.f32 %v88_v23, 0.0 }
  0x82   :  { %v91_v28 = vsub.f32 0.0, %v89_v25  ;;  %v92_v29 = vsub.f32 0.0, %v90_v26 }
  0x84   :  { %v93_v30 = vmul.f32 1.442695, %v91_v28  ;;  %v95_v31 = vmul.f32 1.442695, %v92_v29  ;;  %207 = vadd.xlane.f32.xlu0 %v206_v27 }
  0x86   :  { %282 = vpow2.f32 %v93_v30 }
  0x87   :  { %284 = vpow2.f32 %v95_v31 }
  0x90   :  { %v283_v32 = vpop.eup %282 }
  0x91   :  { %v285_v33 = vpop.eup %284  ;;  %v97_v34 = vadd.f32 1.0, %v283_v32  ;;  %v100_v36 = vmul.f32 -0.5, %v283_v32  ;;  %v103_v39 = vand.u32 2147483647, %v283_v32 }
  0x92   :  { %v106_v35 = vadd.f32 1.0, %v285_v33  ;;  %v109_v37 = vmul.f32 -0.5, %v285_v33  ;;  %v112_v41 = vand.u32 2147483647, %v285_v33 }
  0x93   :  { %286 = vlog2.f32 %v97_v34  ;;  %v101_v38 = vadd.f32 1.0, %v100_v36  ;;  %vm104_vm2 = vcmp.lt.f32.partialorder %v103_v39, 0.0004427343 }
  0x94   :  { %288 = vlog2.f32 %v106_v35  ;;  %v110_v40 = vadd.f32 1.0, %v109_v37  ;;  %vm113_vm3 = vcmp.lt.f32.partialorder %v112_v41, 0.0004427343 }
  0x95   :  { %v102_v42 = vmul.f32 %v283_v32, %v101_v38 }
  0x96   :  { %v111_v45 = vmul.f32 %v285_v33, %v110_v40 }
  0x9d   :  { %v287_v43 = vpop.eup %286 }
  0x9e   :  { %v289_v46 = vpop.eup %288  ;;  %v99_v48 = vmul.f32 0.6931472, %v287_v43 }
  0x9f   :  { %v108_v49 = vmul.f32 0.6931472, %v289_v46 }
  0xa0   :  { %v105_v50 = vsel %vm104_vm2, %v102_v42, %v99_v48 }
  0xa1   :  { %v114_v51 = vsel %vm113_vm3, %v111_v45, %v108_v49  ;;  %v117_v52 = vsub.f32 %v105_v50, %v115_v44 }
  0xa2   :  { %v118_v53 = vsub.f32 %v114_v51, %v116_v47 }
  0xa3   :  { %v186_v54 = vsel %vm122_vm4, %v117_v52, 0.0 }
  0xa4   :  { %v187_v55 = vsel %vm123_vm5, %v118_v53, 0.0 }
  0xa5   :  { %v218_v56 = vadd.f32 %v187_v55, %v186_v54 }
  0xa7   :  { %219 = vadd.xlane.f32.xlu1 %v218_v56 }
 0x10d   :  { %v196_v57 = vpop.xlane.xlu0 %195 }
 0x10e   :  { %v197_v58 = vrot.slane %v196_v57, 4 }
 0x110   :  { %v198_v59 = vadd.f32 %v197_v58, %v196_v57 }
 0x111   :  { %v208_v60 = vpop.xlane.xlu0 %207 }
 0x112   :  { %v199_v61 = vrot.slane %v198_v59, 2  ;;  %v209_v62 = vrot.slane %v208_v60, 4 }
 0x114   :  { %v210_v63 = vadd.f32 %v209_v62, %v208_v60  ;;  %v200_v0 = vadd.f32 %v199_v61, %v198_v59 }
 0x116   :  { %v211_v1 = vrot.slane %v210_v63, 2  ;;  %v201_v2 = vrot.slane %v200_v0, 1 }
 0x118   :  { %v212_v3 = vadd.f32 %v211_v1, %v210_v63  ;;  %v202_v4 = vadd.f32 %v201_v2, %v200_v0 }
 0x11a   :  { %261 = vpush %v202_v4  ;;  %v213_v5 = vrot.slane %v212_v3, 1 }
 0x11c   :  { %v214_v6 = vadd.f32 %v213_v5, %v212_v3 }
 0x11e   :  { %263 = vpush %v214_v6 }
 0x134   :  { %v220_v7 = vpop.xlane.xlu1 %219 }
 0x135   :  { %v221_v8 = vrot.slane %v220_v7, 4 }
 0x137   :  { %v222_v9 = vadd.f32 %v221_v8, %v220_v7 }
 0x139   :  { %v223_v10 = vrot.slane %v222_v9, 2 }
 0x13b   :  { %v224_v11 = vadd.f32 %v223_v10, %v222_v9 }
 0x13d   :  { %v225_v12 = vrot.slane %v224_v11, 1 }
 0x13f   :  { %v226_v13 = vadd.f32 %v225_v12, %v224_v11 }
 0x141   :  { %265 = vpush %v226_v13 }
 0x14b   :  { %s262_s25 = spop %261 }
 0x14f   :  { %s264_s26 = spop %263 }
 0x150   :  { %s228_s27 = ssub.f32 2048.0, %s264_s26  ;;  %v229_v14 = vstv %s264_s26 }
 0x151   :  { %290 = vrcp.f32 %v229_v14 }
 0x152   :  { %v233_v15 = vstv %s228_s27 }
 0x153   :  { %292 = vrcp.f32 %v233_v15 }
 0x15b   :  { %v291_v16 = vpop.eup %290 }
 0x15c   :  { %267 = vpush %v291_v16 }
 0x15d   :  { %v293_v17 = vpop.eup %292 }
 0x15e   :  { %269 = vpush %v293_v17 }
 0x172   :  { %s266_s28 = spop %265 }
 0x18d   :  { %s268_s29 = spop %267 }
 0x18e   :  { %s232_s30 = smul.f32 %s268_s29, %s262_s25 }
 0x18f   :  { %s270_s4 = spop %269 }
 0x190   :  { %s236_s0 = smul.f32 %s270_s4, %s266_s28 }
 0x192   :  { %s237_s5 = sadd.f32 %s236_s0, %s232_s30 }
 0x194   :  { %239 = sst [smem:[#allocation12]] %s237_s5 }
 0x195   :  { %357 = shalt.err (!%p354_p7)
}
 0x196   :  { %s372_s13 = smov [#allocation12]  }
 0x197   :  { %247 = dma.smem_to_hbm %s372_s13, 16, %s454_s3, [#allocation8]  }
 0x198   :  { %364 = dma.done.wait [#allocation8], 16  }
 0x199   :  { %365 = vsyncadd [#allocation8], 4294967280 }
 0x19a   :  { %251 = sfence }
 0x19b   :  { %252 = vsyncpa [#allocation6], 1 }
 0x19c   :  { %253 = vsyncpa [#allocation11], 1 }
 0x19d   :  { %254 = vsyncpa [#allocation7], 1 }
 0x19e   :  { %255 = vsyncpa [#allocation8], 1 }

</bundles_post_ra>
